<compile_context>
chip_gen: v5e
topology: v5e:2x2
jax: 0.10.0
libtpu: 0.0.40
codegen_flags: <defaults>
</compile_context>

<pallas_src>
import functools
import math

import jax
import jax.numpy as jnp
from jax import lax
from jax.experimental import pallas as pl
from jax.experimental.pallas import tpu as pltpu

SELU_ALPHA = 1.6732632423543772
SELU_SCALE = 1.0507009873554805
N_FEAT = 5


def _selu(x):
    # Clamp the exp argument so the discarded branch stays finite.
    return SELU_SCALE * jnp.where(
        x > 0, x, SELU_ALPHA * (jnp.exp(jnp.minimum(x, 0.0)) - 1.0))


def _round_up(x, m):
    return ((x + m - 1) // m) * m


def article_embed_kernel(x_ref, w1_ref, b1_ref, w2_ref, b2_ref, o_ref, *,
                         k1, n_feat):
    # x_ref : (tile_n, xw)   activations + packed index columns (see header)
    # w1_ref: (xw, HPAD)     W1 zero-padded (index/pad cols & lanes >= dim -> 0)
    # b1_ref: (1, HPAD) f32  bias zero-padded beyond dim
    # w2_ref: (HPAD, dim)    [W2; all embedding tables; zeros]
    # b2_ref: (1, dim)  f32
    x = x_ref[...]                                            # (tile_n, xw)

    # ---- Linear #1 + SELU (one MXU pass, K = xw). Lanes >= dim stay exactly 0.
    h = jnp.dot(x, w1_ref[...], preferred_element_type=jnp.float32) + b1_ref[...]
    h = _selu(h)                                              # (tile_n, HPAD) f32
    # TODO(synk): dropout between SELU and Linear #2 is identity here.

    # ---- Fused categorical gathers: one-hot lanes in [dim, dim+v_total).
    tile_n, hpad = h.shape
    lane = lax.broadcasted_iota(jnp.int32, (tile_n, hpad), 1)
    oh = None
    for f in range(n_feat):
        # Packed index column: exact small integer stored in the input dtype.
        idx_f = x[:, k1 + f:k1 + f + 1].astype(jnp.float32).astype(jnp.int32)
        m = lane == idx_f                                     # (tile_n, hpad) bool
        oh = m if oh is None else (oh | m)                    # ranges are disjoint
    z = h + oh.astype(jnp.float32)                            # h | one-hots, no relayout

    # ---- Linear #2 + gather-sum in a single MXU pass.
    y = jnp.dot(z.astype(w2_ref.dtype), w2_ref[...],
                preferred_element_type=jnp.float32) + b2_ref[...]
    o_ref[...] = y.astype(o_ref.dtype)


def article_embedding_forward(params, article, temporal, weekdays, hours, *,
                              tile_n=2048):
    embeddings, category_embeddings, premium, sentiment, mask = article
    w1, b1, w2, b2 = params["w1"], params["b1"], params["w2"], params["b2"]

    fin = w1.shape[0]                 # article_embedding_size + category_embedding_size
    dim = w2.shape[1]
    e_art = embeddings.shape[-1]
    keep = fin - e_art                # category columns the module keeps
    e_cat_full = category_embeddings.shape[-1]
    assert 0 <= keep <= e_cat_full, (
        f"category embeddings too narrow: need {keep}, got {e_cat_full}")

    in_dtype = embeddings.dtype
    compute_dtype = jnp.bfloat16 if in_dtype == jnp.bfloat16 else jnp.float32

    # ---- Stacked weights -----------------------------------------------------
    tables = [params["emb_premium"], params["emb_sentiment"],
              params["emb_temporal"], params["emb_weekday"], params["emb_hour"]]
    sizes = [int(t.shape[0]) for t in tables]
    v_total = int(sum(sizes))
    offsets, acc = [], 0
    for s in sizes:
        offsets.append(acc)
        acc += s

    hpad = max(128, _round_up(dim + v_total, 128))            # hidden slab width
    max_idx = dim + v_total - 1
    if compute_dtype == jnp.bfloat16:
        # Packed indices must be exactly representable in bf16 (ints <= 256).
        assert max_idx < 256, "packed-index path needs dim + total_vocab <= 256 for bf16"

    k1 = e_art + keep                                         # == fin
    xw = k1 + _round_up(N_FEAT, 8)                            # activation + index cols

    w1_ext = (jnp.zeros((xw, hpad), jnp.float32)
              .at[:k1, :dim].set(w1.astype(jnp.float32))
              .astype(compute_dtype))
    b1_pad = jnp.zeros((1, hpad), jnp.float32).at[:, :dim].set(b1.astype(jnp.float32))
    table = jnp.concatenate([t.astype(jnp.float32) for t in tables], axis=0)
    w2_stk = (jnp.zeros((hpad, dim), jnp.float32)
              .at[:dim, :].set(w2.astype(jnp.float32))
              .at[dim:dim + v_total, :].set(table)
              .astype(compute_dtype))
    b2_f = b2.astype(jnp.float32)

    # ---- Activation + packed-index stream -----------------------------------
    lead = embeddings.shape[:-1]
    n_rows = math.prod(lead)
    emb_flat = embeddings.reshape(n_rows, e_art).astype(compute_dtype)
    cat_flat = (category_embeddings[..., :keep]
                .reshape(n_rows, keep).astype(compute_dtype))
    idx = jnp.stack([
        premium + (dim + offsets[0]),
        sentiment + (dim + offsets[1]),
        temporal + (dim + offsets[2]),
        weekdays + (dim + offsets[3]),
        hours + (dim + offsets[4]),
    ], axis=-1).reshape(n_rows, N_FEAT).astype(compute_dtype)
    pad_cols = xw - k1 - N_FEAT
    pieces = [emb_flat, cat_flat, idx]
    if pad_cols:
        pieces.append(jnp.zeros((n_rows, pad_cols), compute_dtype))
    x_aug = jnp.concatenate(pieces, axis=-1)                  # (n_rows, xw)

    # ---- Tile sizing: big tiles, but keep >= ~4 grid steps for v7x megacore --
    requested = max(8, _round_up(int(tile_n), 8))
    balanced = max(8, _round_up(-(-n_rows // 4), 8))
    tile_n = min(requested, balanced)
    n_pad = _round_up(n_rows, tile_n)
    if n_pad > n_rows:
        x_aug = jnp.pad(x_aug, ((0, n_pad - n_rows), (0, 0)))

    grid = (n_pad // tile_n,)
    kernel = functools.partial(article_embed_kernel, k1=k1, n_feat=N_FEAT)

    out_flat = pl.pallas_call(
        kernel,
        out_shape=jax.ShapeDtypeStruct((n_pad, dim), in_dtype),
        grid_spec=pltpu.PrefetchScalarGridSpec(
            num_scalar_prefetch=0,
            grid=grid,
            in_specs=[
                pl.BlockSpec((tile_n, xw), lambda i: (i, 0)),
                pl.BlockSpec((xw, hpad), lambda i: (0, 0)),
                pl.BlockSpec((1, hpad), lambda i: (0, 0)),
                pl.BlockSpec((hpad, dim), lambda i: (0, 0)),
                pl.BlockSpec((1, dim), lambda i: (0, 0)),
            ],
            out_specs=pl.BlockSpec((tile_n, dim), lambda i: (i, 0)),
        ),
        compiler_params=pltpu.CompilerParams(
            dimension_semantics=("parallel",),
        ),
    )(x_aug, w1_ext, b1_pad, w2_stk, b2_f)

    out = out_flat[:n_rows].reshape(*lead, dim)
    return out, mask


def _reference_forward(params, article, temporal, weekdays, hours):
    embeddings, category_embeddings, premium, sentiment, mask = article
    w1, b1, w2, b2 = params["w1"], params["b1"], params["w2"], params["b2"]
    keep = w1.shape[0] - embeddings.shape[-1]
    x = jnp.concatenate([embeddings.astype(jnp.float32),
                         category_embeddings[..., :keep].astype(jnp.float32)],
                        axis=-1)
    h = _selu(x @ w1 + b1[0])
    y = h @ w2 + b2[0]
    y = y + params["emb_premium"][premium]
    y = y + params["emb_sentiment"][sentiment]
    y = y + params["emb_temporal"][temporal]
    y = y + params["emb_weekday"][weekdays]
    y = y + params["emb_hour"][hours]
    return y, mask


def make_params(key, article_embedding_size, category_embedding_size,
                premium, sentiments, temporal, weekdays, hours, dimensionality):
    fin = article_embedding_size + category_embedding_size
    keys = jax.random.split(key, 9)
    scale = 0.05
    return {
        "w1": scale * jax.random.normal(keys[0], (fin, dimensionality), jnp.float32),
        "b1": scale * jax.random.normal(keys[1], (1, dimensionality), jnp.float32),
        "w2": scale * jax.random.normal(keys[2], (dimensionality, dimensionality), jnp.float32),
        "b2": scale * jax.random.normal(keys[3], (1, dimensionality), jnp.float32),
        "emb_premium": scale * jax.random.normal(keys[4], (premium, dimensionality), jnp.float32),
        "emb_sentiment": scale * jax.random.normal(keys[5], (sentiments, dimensionality), jnp.float32),
        "emb_temporal": scale * jax.random.normal(keys[6], (temporal, dimensionality), jnp.float32),
        "emb_weekday": scale * jax.random.normal(keys[7], (weekdays, dimensionality), jnp.float32),
        "emb_hour": scale * jax.random.normal(keys[8], (hours, dimensionality), jnp.float32),
    }


if __name__ == "__main__":
    B, S = 2, 8
    ART_E, CAT_E = 24, 8          # article / category embedding sizes
    DIM = 32                      # dimensionality
    N_PREMIUM, N_SENT, N_TEMP, N_WD, N_HR = 2, 3, 5, 7, 24

    key = jax.random.PRNGKey(0)
    k_par, k_emb, k_cat, k_idx = jax.random.split(key, 4)
    params = make_params(k_par, ART_E, CAT_E, N_PREMIUM, N_SENT, N_TEMP, N_WD, N_HR, DIM)

    def make_inputs(ke, kc, ki, b, s, dtype):
        embeddings = jax.random.normal(ke, (b, s, ART_E), jnp.float32).astype(dtype)
        # category embeddings intentionally wider than needed; forward handles the slice.
        category_embeddings = jax.random.normal(kc, (b, s, CAT_E + 4), jnp.float32).astype(dtype)
        ik = jax.random.split(ki, 5)
        premium_idx = jax.random.randint(ik[0], (b, s), 0, N_PREMIUM)
        sentiment_idx = jax.random.randint(ik[1], (b, s), 0, N_SENT)
        temporal_idx = jax.random.randint(ik[2], (b, s), 0, N_TEMP)
        weekday_idx = jax.random.randint(ik[3], (b, s), 0, N_WD)
        hour_idx = jax.random.randint(ik[4], (b, s), 0, N_HR)
        mask = jnp.ones((b, s), jnp.bool_)
        article = (embeddings, category_embeddings, premium_idx, sentiment_idx, mask)
        return article, temporal_idx, weekday_idx, hour_idx

    # --- small f32 case (module-consistent shapes), tight tolerance ---
    article, temporal_idx, weekday_idx, hour_idx = make_inputs(
        k_emb, k_cat, k_idx, B, S, jnp.float32)
    out, out_mask = article_embedding_forward(
        params, article, temporal_idx, weekday_idx, hour_idx, tile_n=2048)
    out = jax.block_until_ready(out)
    ref, _ = _reference_forward(params, article, temporal_idx, weekday_idx, hour_idx)
    assert out.shape == (B, S, DIM)
    assert jnp.allclose(out, ref, atol=1e-5, rtol=1e-5), "kernel mismatch vs reference (f32)"

    # --- larger bf16 case: exercises row padding, multi-step grid, bf16 MXU path ---
    B2, S2 = 4, 300               # 1200 rows -> tile 304, padded to 1216, grid of 4
    k2 = jax.random.split(jax.random.PRNGKey(1), 3)
    article2, temporal2, weekday2, hour2 = make_inputs(
        k2[0], k2[1], k2[2], B2, S2, jnp.bfloat16)
    out2, _ = article_embedding_forward(
        params, article2, temporal2, weekday2, hour2, tile_n=2048)
    out2 = jax.block_until_ready(out2)
    ref2, _ = _reference_forward(params, article2, temporal2, weekday2, hour2)
    assert out2.shape == (B2, S2, DIM)
    assert jnp.allclose(out2.astype(jnp.float32), ref2, atol=2e-2, rtol=2e-2), \
        "kernel mismatch vs reference (bf16)"

    print("KERNEL_OK")
</pallas_src>

<mosaic_0001>
module attributes {stable_mosaic.version = 11 : i64} {
  func.func @article_embed_kernel(%arg0: i32, %arg1: memref<8x40xf32, #tpu.memory_space<vmem>>, %arg2: memref<40x128xf32, #tpu.memory_space<vmem>>, %arg3: memref<1x128xf32, #tpu.memory_space<vmem>>, %arg4: memref<128x32xf32, #tpu.memory_space<vmem>>, %arg5: memref<1x32xf32, #tpu.memory_space<vmem>>, %arg6: memref<8x32xf32, #tpu.memory_space<vmem>>) attributes {dimension_semantics = [#tpu.dimension_semantics<parallel>], iteration_bounds = array<i64: 2>, scalar_prefetch = 0 : i64, scratch_operands = 0 : i64, tpu.core_type = #tpu.core_type<tc>, window_params = [{transform_indices = @transform_0, window_bounds = array<i64: 8, 40>}, {pipeline_mode = #tpu.pipeline_mode<synchronous>, transform_indices = @transform_1, window_bounds = array<i64: 40, 128>}, {pipeline_mode = #tpu.pipeline_mode<synchronous>, transform_indices = @transform_2, window_bounds = array<i64: 1, 128>}, {pipeline_mode = #tpu.pipeline_mode<synchronous>, transform_indices = @transform_3, window_bounds = array<i64: 128, 32>}, {pipeline_mode = #tpu.pipeline_mode<synchronous>, transform_indices = @transform_4, window_bounds = array<i64: 1, 32>}, {transform_indices = @transform_5, window_bounds = array<i64: 8, 32>}]} {
    %c0 = arith.constant 0 : index
    %c0_0 = arith.constant 0 : index
    %0 = vector.load %arg1[%c0, %c0_0] : memref<8x40xf32, #tpu.memory_space<vmem>>, vector<8x40xf32>
    %c0_1 = arith.constant 0 : index
    %c0_2 = arith.constant 0 : index
    %1 = vector.load %arg2[%c0_1, %c0_2] : memref<40x128xf32, #tpu.memory_space<vmem>>, vector<40x128xf32>
    %cst = arith.constant dense<0.000000e+00> : vector<8x128xf32>
    %2 = tpu.matmul %0, %1, %cst {dimension_numbers = #tpu.dot_dimension_numbers<[1], [0], [0], [1], [0, 0, 1, 1], [], []>} : vector<8x40xf32>, vector<40x128xf32>, vector<8x128xf32> -> vector<8x128xf32>
    %c0_3 = arith.constant 0 : index
    %c0_4 = arith.constant 0 : index
    %3 = vector.load %arg3[%c0_3, %c0_4] : memref<1x128xf32, #tpu.memory_space<vmem>>, vector<1x128xf32>
    %4 = vector.broadcast %3 : vector<1x128xf32> to vector<8x128xf32>
    %5 = arith.addf %2, %4 : vector<8x128xf32>
    %cst_5 = arith.constant 0.000000e+00 : f32
    %6 = vector.broadcast %cst_5 : f32 to vector<8x128xf32>
    %7 = arith.cmpf ogt, %5, %6 : vector<8x128xf32>
    %cst_6 = arith.constant 0.000000e+00 : f32
    %8 = vector.broadcast %cst_6 : f32 to vector<8x128xf32>
    %9 = arith.minimumf %5, %8 : vector<8x128xf32>
    %10 = math.exp %9 : vector<8x128xf32>
    %cst_7 = arith.constant 1.000000e+00 : f32
    %11 = vector.broadcast %cst_7 : f32 to vector<8x128xf32>
    %12 = arith.subf %10, %11 : vector<8x128xf32>
    %cst_8 = arith.constant 1.67326319 : f32
    %13 = vector.broadcast %cst_8 : f32 to vector<8x128xf32>
    %14 = arith.mulf %13, %12 : vector<8x128xf32>
    %15 = arith.select %7, %5, %14 : vector<8x128xi1>, vector<8x128xf32>
    %cst_9 = arith.constant 1.05070102 : f32
    %16 = vector.broadcast %cst_9 : f32 to vector<8x128xf32>
    %17 = arith.mulf %16, %15 : vector<8x128xf32>
    %18 = tpu.iota {dimensions = array<i32: 1>} : vector<8x128xi32>
    %19 = vector.extract_strided_slice %0 {offsets = [0, 32], sizes = [8, 1], strides = [1, 1]} : vector<8x40xf32> to vector<8x1xf32>
    %20 = arith.fptosi %19 : vector<8x1xf32> to vector<8x1xi32>
    %21 = vector.broadcast %20 : vector<8x1xi32> to vector<8x128xi32>
    %22 = arith.cmpi eq, %18, %21 : vector<8x128xi32>
    %23 = vector.extract_strided_slice %0 {offsets = [0, 33], sizes = [8, 1], strides = [1, 1]} : vector<8x40xf32> to vector<8x1xf32>
    %24 = arith.fptosi %23 : vector<8x1xf32> to vector<8x1xi32>
    %25 = vector.broadcast %24 : vector<8x1xi32> to vector<8x128xi32>
    %26 = arith.cmpi eq, %18, %25 : vector<8x128xi32>
    %27 = arith.ori %22, %26 : vector<8x128xi1>
    %28 = vector.extract_strided_slice %0 {offsets = [0, 34], sizes = [8, 1], strides = [1, 1]} : vector<8x40xf32> to vector<8x1xf32>
    %29 = arith.fptosi %28 : vector<8x1xf32> to vector<8x1xi32>
    %30 = vector.broadcast %29 : vector<8x1xi32> to vector<8x128xi32>
    %31 = arith.cmpi eq, %18, %30 : vector<8x128xi32>
    %32 = arith.ori %27, %31 : vector<8x128xi1>
    %33 = vector.extract_strided_slice %0 {offsets = [0, 35], sizes = [8, 1], strides = [1, 1]} : vector<8x40xf32> to vector<8x1xf32>
    %34 = arith.fptosi %33 : vector<8x1xf32> to vector<8x1xi32>
    %35 = vector.broadcast %34 : vector<8x1xi32> to vector<8x128xi32>
    %36 = arith.cmpi eq, %18, %35 : vector<8x128xi32>
    %37 = arith.ori %32, %36 : vector<8x128xi1>
    %38 = vector.extract_strided_slice %0 {offsets = [0, 36], sizes = [8, 1], strides = [1, 1]} : vector<8x40xf32> to vector<8x1xf32>
    %39 = arith.fptosi %38 : vector<8x1xf32> to vector<8x1xi32>
    %40 = vector.broadcast %39 : vector<8x1xi32> to vector<8x128xi32>
    %41 = arith.cmpi eq, %18, %40 : vector<8x128xi32>
    %42 = arith.ori %37, %41 : vector<8x128xi1>
    %43 = arith.extui %42 : vector<8x128xi1> to vector<8x128xi32>
    %44 = arith.sitofp %43 : vector<8x128xi32> to vector<8x128xf32>
    %45 = arith.addf %17, %44 : vector<8x128xf32>
    %c0_10 = arith.constant 0 : index
    %c0_11 = arith.constant 0 : index
    %46 = vector.load %arg4[%c0_10, %c0_11] : memref<128x32xf32, #tpu.memory_space<vmem>>, vector<128x32xf32>
    %cst_12 = arith.constant dense<0.000000e+00> : vector<8x32xf32>
    %47 = tpu.matmul %45, %46, %cst_12 {dimension_numbers = #tpu.dot_dimension_numbers<[1], [0], [0], [1], [0, 0, 1, 1], [], []>} : vector<8x128xf32>, vector<128x32xf32>, vector<8x32xf32> -> vector<8x32xf32>
    %c0_13 = arith.constant 0 : index
    %c0_14 = arith.constant 0 : index
    %48 = vector.load %arg5[%c0_13, %c0_14] : memref<1x32xf32, #tpu.memory_space<vmem>>, vector<1x32xf32>
    %49 = vector.broadcast %48 : vector<1x32xf32> to vector<8x32xf32>
    %50 = arith.addf %47, %49 : vector<8x32xf32>
    %c0_15 = arith.constant 0 : index
    %c0_16 = arith.constant 0 : index
    %51 = vector.load %arg6[%c0_15, %c0_16] : memref<8x32xf32, #tpu.memory_space<vmem>>, vector<8x32xf32>
    tpu.vector_store %arg6[%c0_15, %c0_16], %50 {strides = array<i32>} : memref<8x32xf32, #tpu.memory_space<vmem>>, vector<8x32xf32>,
    return
  }
  func.func @transform_0(%arg0: i32) -> (i32, i32) {
    %c0_i32 = arith.constant 0 : i32
    %c0_i32_0 = arith.constant 0 : i32
    return %arg0, %c0_i32 : i32, i32
  }
  func.func @transform_1(%arg0: i32) -> (i32, i32) {
    %c0_i32 = arith.constant 0 : i32
    %c0_i32_0 = arith.constant 0 : i32
    %c0_i32_1 = arith.constant 0 : i32
    return %c0_i32, %c0_i32_0 : i32, i32
  }
  func.func @transform_2(%arg0: i32) -> (i32, i32) {
    %c0_i32 = arith.constant 0 : i32
    %c0_i32_0 = arith.constant 0 : i32
    %c0_i32_1 = arith.constant 0 : i32
    return %c0_i32, %c0_i32_0 : i32, i32
  }
  func.func @transform_3(%arg0: i32) -> (i32, i32) {
    %c0_i32 = arith.constant 0 : i32
    %c0_i32_0 = arith.constant 0 : i32
    %c0_i32_1 = arith.constant 0 : i32
    return %c0_i32, %c0_i32_0 : i32, i32
  }
  func.func @transform_4(%arg0: i32) -> (i32, i32) {
    %c0_i32 = arith.constant 0 : i32
    %c0_i32_0 = arith.constant 0 : i32
    %c0_i32_1 = arith.constant 0 : i32
    return %c0_i32, %c0_i32_0 : i32, i32
  }
  func.func @transform_5(%arg0: i32) -> (i32, i32) {
    %c0_i32 = arith.constant 0 : i32
    %c0_i32_0 = arith.constant 0 : i32
    return %arg0, %c0_i32 : i32, i32
  }
}

</mosaic_0001>

<bundles_post_ra>
// kernel: tpu_custom_call.1
= control target key start
LH: loop header
LB: loop body
LE: loop exit
PB: predicated region body
PF: predicated region fallthrough
CT: control target
= control target key end

     0   :  { %10 = vsyncpa [#allocation3], 0  ;;  %s736_s0 = inlined_call_operand.vmem [shape: f32[16,40], index: 0, kind: input, shape index: {}]   ;;  %s737_s1 = inlined_call_operand.vmem [shape: f32[40,128], index: 1, kind: input, shape index: {}]   ;;  %s738_s2 = inlined_call_operand.vmem [shape: f32[1,128], index: 2, kind: input, shape index: {}]   ;;  %s739_s3 = inlined_call_operand.vmem [shape: f32[128,32], index: 3, kind: input, shape index: {}]   ;;  %s740_s4 = inlined_call_operand.vmem [shape: f32[1,32], index: 4, kind: input, shape index: {}]   ;;  %s741_s5 = inlined_call_operand.hbm [shape: f32[16,32], index: 5, kind: output, shape index: {}]  }
   0x1   :  { %12 = vsyncpa [#allocation3 + $0x1], 0  ;;  %s582_s18 = smov 0   ;;  %s584_s19 = smov 0  }
   0x2   :  { %s586_s20 = smov 0   ;;  %s588_s21 = smov 0  }
   0x3 LB: > { %s603_s22 = sadd.s32 4294967295, %s544_s21   ;;  %s409_s23 = sadd.s32 4294967294, %s544_s21   ;;  %s544_s21 = sphi %s588_s21, %s747_s21   ;;  %s540_s20 = sphi %s586_s20, %s746_s20   ;;  %s536_s19 = sphi %s584_s19, %s745_s19   ;;  %s532_s18 = sphi %s582_s18, %s744_s18  }
   0x4   : > { %s607_s24 = sadd.s32 1, %s544_s21   ;;  %s135_s25 = sadd.s32 1, %s540_s20 }
   0x5   : > { %s132_s26 = ssub.s32 %s544_s21, %s607_s24  ;;  %p145_p0 = scmp.ne.s32.totalorder %s540_s20, %s536_s19 }
   0x6   : > { %p133_p1 = scmp.eq.s32.totalorder %s132_s26, 0  ;;  %p146_p2 = scmp.eq.s32.totalorder %s603_s22, 1 }
   0x7   : > { %p151_p3 = scmp.ne.s32.totalorder %s536_s19, %s532_s18  ;;  %p152_p4 = scmp.eq.s32.totalorder %s409_s23, 1 }
   0x8   : > { %s618_s27 = scalar_select %p133_p1, %s540_s20, %s135_s25  }
   0x9   : > { %p620_p5 = por %p146_p2, %p145_p0  ;;  %p624_p6 = por %p152_p4, %p151_p3 }
   0xa   : > { %p412_p7 = scmp.ge.s32.totalorder %s544_s21, 1  ;;  %p189_p8 = scmp.lt.s32.totalorder %s544_s21, 3 }
   0xc   : > { %p190_p9 = pnand %p412_p7, %p189_p8 }
   0xd   : > { %p216_p10 = scmp.lt.s32.totalorder (!%p190_p9), %s603_s22, 1  ;;  %s213_s6 = sand.u32 (!%p190_p9), 1, %s536_s19  }
   0xe   : > { %193 = sbr.rel (%p190_p9) target bundleno = 308 (0x134), region = 40  ;;  %s419_s8 = sshll.u32 (!%p190_p9), %s603_s22, 3 }
   0xf   : > { %s335_s17 = scalar_lea.sflag (!%p190_p9), [#allocation3], %s213_s6  ;;  %s502_s30 = scalar_lea.hbm (!%p190_p9), %s741_s5, 16 }
  0x13   : > { %v225_v0 = vld [vmem:[%s737_s1 + $0x20] sm:$0xff]  ;;  %v224_v1 = vld [vmem:[%s737_s1 + $0x18] sm:$0xff]  ;;  %v546_v2 = vmov 32   ;;  %v223_v3 = vld [vmem:[%s737_s1 + $0x10] sm:$0xff]  ;;  %s217_s11 = scalar_select %p216_p10, %s603_s22, 1  ;;  %v547_v4 = vmov 34   ;;  %v262_v32 = vlaneseq }
  0x14   : > { %245 = vmatpush.msra.mxu0 %v225_v0  ;;  %472 = vset.pattern.permute.xlu0 %v546_v2  ;;  %v548_v5 = vmov 36   ;;  %v307_v6 = vld [vmem:[%s739_s3 + $0x78] sm:$0xff]  ;;  %v306_v7 = vld [vmem:[%s739_s3 + $0x70] sm:$0xff]  ;;  %v222_v8 = vld [vmem:[%s737_s1 + $0x8] sm:$0xff]  ;;  %vm230_vm0 = vcmask 326656   ;;  %v549_v16 = vmov 33  }
  0x15   : > { %474 = vset.pattern.permute.xlu1 %v547_v4  ;;  %476 = vset.pattern.permute.xlu2 %v548_v5  ;;  %s414_s23 = sshll.u32 %s217_s11, 3  ;;  %v305_v9 = vld [vmem:[%s739_s3 + $0x68] sm:$0xff]  ;;  %v221_v10 = vld [vmem:[%s737_s1] sm:$0xff]  ;;  %v550_v17 = vmov 35   ;;  %v303_v19 = vld [vmem:[%s739_s3 + $0x58] sm:$0xff]  ;;  %v263_v36 = vand.u32 127, %v262_v32  ;;  %s345_s11 = scalar_lea.hbm %s741_s5, %s419_s8 }
  0x16   : > { %246 = vmatpush.msra.mxu0 %v224_v1  ;;  %312 = vmatpush.msra.mxu1 %v307_v6  ;;  %s219_s7 = scalar_lea.vmem %s736_s0, %s414_s23  ;;  %v304_v18 = vld [vmem:[%s739_s3 + $0x60] sm:$0xff]  ;;  %v302_v20 = vld [vmem:[%s739_s3 + $0x50] sm:$0xff]  ;;  %v301_v21 = vld [vmem:[%s739_s3 + $0x48] sm:$0xff]  ;;  %v551_v48 = vmov 0.0   ;;  %s349_s16 = sshll.u32 %s345_s11, 4  ;;  %vm332_vm12 = vcmask 261120   ;;  %s350_s16 = int_to_ptr.hbm [resolvable:$true] %s349_s16 }
  0x17   : > { %v220_v11 = vld [vmem:[%s219_s7] sm:$0xff]  ;;  %v299_v23 = vld [vmem:[%s739_s3 + $0x38] sm:$0xff]  ;;  %v298_v24 = vld [vmem:[%s739_s3 + $0x30] sm:$0xff]  ;;  %s413_s7 = sshll.u32 %s213_s6, 3  ;;  %s496_s22 = sshra.s32 %s350_s16, 4  ;;  %s497_s22 = int_to_ptr.hbm [resolvable:$true] %s496_s22 }
  0x18   : > { %247 = vmatpush.msra.mxu0 %v223_v3  ;;  %313 = vmatpush.msra.mxu1 %v306_v7  ;;  %vm422_vm1 = vcmp.lt.s32.totalorder %v220_v11, 0  ;;  %v423_v12 = vceil.f32 %v220_v11  ;;  %v424_v13 = vfloor.f32 %v220_v11  ;;  %v300_v22 = vld [vmem:[%s739_s3 + $0x40] sm:$0xff]  ;;  %v297_v25 = vld [vmem:[%s739_s3 + $0x28] sm:$0xff]  ;;  %v295_v27 = vld [vmem:[%s739_s3 + $0x18] sm:$0xff]  ;;  %s215_s14 = scalar_lea.vmem [#allocation2], %s413_s7  ;;  %s498_s23 = scalar_lea.hbm %s497_s22, 8 }
  0x19   : > { %v296_v26 = vld [vmem:[%s739_s3 + $0x20] sm:$0xff]  ;;  %v294_v28 = vld [vmem:[%s739_s3 + $0x10] sm:$0xff]  ;;  %v293_v29 = vld [vmem:[%s739_s3 + $0x8] sm:$0xff]  ;;  %s347_s15 = sshll.u32 %s215_s14, 4  ;;  %p499_p11 = scmp.ne.s32.totalorder %s497_s22, %s498_s23  ;;  %s348_s15 = int_to_ptr.vmem [resolvable:$true] %s347_s15 }
  0x1a   : > { %248 = vmatpush.msra.mxu0 %v222_v8  ;;  %314 = vmatpush.msra.mxu1 %v305_v9  ;;  %v425_v14 = vsel %vm422_vm1, %v423_v12, %v424_v13  ;;  %v292_v30 = vld [vmem:[%s739_s3] sm:$0xff]  ;;  %p503_p0 = scmp.lt.s32.totalorder %s497_s22, %s741_s5  ;;  %p504_p1 = scmp.lt.s32.totalorder %s502_s30, %s498_s23 }
  0x1b   : > { %v426_v15 = vcvt.f32.s32 %v425_v14  ;;  %v478_v33 = vld [vmem:[%s738_s2] ss:$0 sm:$0xff]  ;;  %p500_p12 = pnand %p499_p11, %p620_p5 }
  0x1c   : > { %249 = vmatpush.msra.mxu0 %v221_v10  ;;  %315 = vmatpush.msra.mxu1 %v304_v18  ;;  %v479_v51 = vld [vmem:[%s740_s4] ss:$0 sm:$0xff]  ;;  %p505_p2 = por %p504_p1, %p503_p0 }
  0x1d   : > { %415 = vmatmul.msk.f32.vlgmr.msra.gmra.mxu0 %vm230_vm0, %v220_v11  ;;  %266 = vperm.xlu0 %472, %v426_v15   ;;  %p501_p13 = pneg %p500_p12 }
  0x1e   : > { %275 = vperm.xlu1 %474, %v426_v15   ;;  %285 = vperm.xlu2 %476, %v426_v15  }
  0x1f   : > { %316 = vmatpush.msra.mxu1 %v303_v19  ;;  %p506_p3 = pnand %p505_p2, %p501_p13 }
  0x21   : > { %317 = vmatpush.msra.mxu1 %v302_v20 }
  0x23   : > { %318 = vmatpush.msra.mxu1 %v301_v21 }
  0x25   : > { %473 = vset.pattern.permute.xlu0 %v549_v16  ;;  %319 = vmatpush.msra.mxu1 %v300_v22 }
  0x26   : > { %475 = vset.pattern.permute.xlu1 %v550_v17  ;;  %270 = vperm.xlu0 %473, %v426_v15  }
  0x27   : > { %280 = vperm.xlu1 %475, %v426_v15   ;;  %320 = vmatpush.msra.mxu1 %v299_v23 }
  0x29   : > { %321 = vmatpush.msra.mxu1 %v298_v24 }
  0x2b   : > { %322 = vmatpush.msra.mxu1 %v297_v25 }
  0x2d   : > { %323 = vmatpush.msra.mxu1 %v296_v26 }
  0x2e   : > { %477 = vset.pattern.permute.xlu0 %v548_v5 }
  0x2f   : > { %324 = vmatpush.msra.mxu1 %v295_v27 }
  0x31   : > { %325 = vmatpush.msra.mxu1 %v294_v28 }
  0x33   : > { %326 = vmatpush.msra.mxu1 %v293_v29 }
  0x35   : > { %327 = vmatpush.msra.mxu1 %v292_v30 }
  0x78   : > { %v286_v42 = vpop.permute.xlu2 %285 }
  0x79   : > { %vm287_vm9 = vcmp.eq.s32.totalorder %v263_v36, %v286_v42 }
  0x8f   : > { %v267_v31 = vpop.permute.xlu0 %266 }
  0x90   : > { %v276_v34 = vpop.permute.xlu1 %275  ;;  %vm268_vm2 = vcmp.eq.s32.totalorder %v263_v36, %v267_v31 }
  0x91   : > { %vm277_vm4 = vcmp.eq.s32.totalorder %v263_v36, %v276_v34 }
  0x98   : > { %v271_v38 = vpop.permute.xlu0 %270 }
  0x99   : > { %vm272_vm3 = vcmp.eq.s32.totalorder %v263_v36, %v271_v38  ;;  %v281_v41 = vpop.permute.xlu1 %280 }
  0x9a   : > { %v251_v35 = vpop.f32.mrf.mxu0  ;;  %vm273_vm5 = vmor %vm268_vm2, %vm272_vm3  ;;  %vm282_vm7 = vcmp.eq.s32.totalorder %v263_v36, %v281_v41 }
  0x9b   : > { %v252_v37 = vadd.f32 %v478_v33, %v251_v35  ;;  %vm278_vm6 = vmor %vm273_vm5, %vm277_vm4 }
  0x9c   : > { %vm283_vm8 = vmor %vm278_vm6, %vm282_vm7 }
  0x9d   : > { %v255_v39 = vmin.f32 %v252_v37, 0.0  ;;  %vm254_vm10 = vcmp.gt.f32.partialorder %v252_v37, 0.0  ;;  %vm288_vm11 = vmor %vm283_vm8, %vm287_vm9 }
  0x9e   : > { %v417_v49 = vsel %vm288_vm11, 1.0, %v551_v48 }
  0x9f   : > { %v256_v40 = vmul.f32 1.442695, %v255_v39 }
  0xa1   : > { %480 = vpow2.f32 %v256_v40 }
  0xa7   : > { %v481_v43 = vpop.eup %480 }
  0xa8   : > { %v416_v44 = vadd.f32 -1.0, %v481_v43 }
  0xaa   : > { %v259_v45 = vmul.f32 1.6732632, %v416_v44 }
  0xac   : > { %v260_v46 = vsel %vm254_vm10, %v252_v37, %v259_v45 }
  0xad   : > { %v261_v47 = vmul.f32 1.050701, %v260_v46 }
  0xaf   : > { %v291_v50 = vadd.f32 %v417_v49, %v261_v47 }
  0xb1   : > { %328 = vmatmul.f32.vlgmr.msra.gmra.mxu1 %v291_v50 }
 0x12e   : > { %v329_v52 = vpop.f32.mrf.mxu1 }
 0x12f   : > { %v330_v53 = vadd.f32 %v479_v51, %v329_v52 }
 0x131   : > { %333 = vst.msk [vmem:[%s215_s14] sm:$0xff] %vm332_vm12, %v330_v53 }
 0x132   : > { %509 = shalt.err (!%p506_p3)
}
 0x133   : > { %427 = dma.vmem_to_hbm [thread:$0]  (%p620_p5), %s348_s15, 128, %s350_s16, %s335_s17  }
 0x134 PF: > { %p433_p4 = scmp.ge.s32.totalorder %s544_s21, 2  ;;  %s361_s6 = sand.u32 1, %s532_s18  }
 0x135   : > { %s362_s9 = scalar_lea.sflag [#allocation3], %s361_s6 }
 0x136   : > { %p430_p7 = pnand %p433_p4, %p624_p6 }
 0x138   : > { %p431_p8 = pneg %p430_p7 }
 0x13a   : > { %527 = dma.done.wait (%p431_p8), %s362_s9, 128  }
 0x13b   : > { %529 = vsyncadd (%p431_p8), %s362_s9, 4294967168  ;;  %p15_p9 = scmp.ge.s32.totalorder %s607_s24, 4   ;;  %s744_s18 = smov %s536_s19 }
 0x13c   : > { %s745_s19 = smov %s540_s20  ;;  %s746_s20 = smov %s618_s27 }
 0x13d   : > { %s747_s21 = smov %s607_s24  ;;  %17 = sbr.rel (!%p15_p9) target bundleno = 3 (0x3), region = 75 }
 0x142   :  { %368 = vsyncpa [#allocation3], 1 }
 0x143   :  { %370 = vsyncpa [#allocation3 + $0x1], 1 }

</bundles_post_ra>
